<compile_context>
chip_gen: v7x
topology: tpu7x:2x2x1
jax: 0.10.0
libtpu: 0.0.40
codegen_flags: <defaults>
</compile_context>

<pallas_src>
import jax
import jax.numpy as jnp
from jax.experimental import pallas as pl
from jax.experimental.pallas import tpu as pltpu

B, L, H, A, F, C, M = 2, 8, 32, 8, 64, 4, 4   # small, forward-consistent shapes
EPS = 1e-12                                   # BertLayerNorm eps (TF style)
OUT_W = 128                                   # lane-dense packed output width


# ---------------- in-kernel helpers (traced) ----------------
def _layernorm(x, gamma, beta, eps=EPS):
    u = jnp.mean(x, axis=-1, keepdims=True)
    s = jnp.mean((x - u) ** 2, axis=-1, keepdims=True)
    return gamma * ((x - u) * jax.lax.rsqrt(s + eps)) + beta


def _softmax(x):
    m = jnp.max(x, axis=-1, keepdims=True)
    e = jnp.exp(x - m)
    return e * pl.reciprocal(jnp.sum(e, axis=-1, keepdims=True), approx=True)


def _mm(a, w):
    # bf16 MXU matmul with f32 accumulation (w is already bf16 from the host).
    return jnp.dot(a.astype(jnp.bfloat16), w, preferred_element_type=jnp.float32)


# ---------------- the Pallas kernel (whole batch in one step) ----------------
def vlnbert_visual_kernel(
        sent_ref, act_ref, cand_ref, mem_ref,
        wq_ref, wk_ref, wv_ref, wasp_ref, wimg_ref, wsp_ref,
        b2h_ref, bh_ref, lng_ref, lnb_ref,
        out_ref):
    b, l, h = sent_ref.shape

    sent = sent_ref[...]                                   # (B, L, H) f32
    cls = sent[:, 0, :]                                    # (B, H)
    rest = sent[:, 1:, :]                                  # (B, L-1, H)
    rest_sum = jnp.sum(rest, axis=1)                       # (B, H)

    b2h = b2h_ref[...]                                     # (2, 2H): bq, bk
    bh = bh_ref[...]                                       # (3, H): basp, bimg, bsp
    lng = lng_ref[...]                                     # (4, H): act, cand, vl, st
    lnb = lnb_ref[...]                                     # (4, H)

    # ---- memory attention (args.use_memory branch) ----
    sq_in = jnp.concatenate([cls, rest_sum], axis=-1)               # (B, 2H)
    state_query = _mm(sq_in, wq_ref[...]) + b2h[0:1, :]             # (B, 2H)

    mem2 = mem_ref[...]                                             # (B*M, 2H) bf16
    m = mem2.shape[0] // b
    mem_key = (_mm(mem2, wk_ref[...]) + b2h[1:2, :]).reshape(b, m, 2 * h)
    scores = jnp.sum(state_query[:, None, :] * mem_key, axis=-1)    # (B, M)
    attn = _softmax(scores)                                         # softmax over M
    mem_val = _mm(mem2[:, :h], wv_ref[...]).reshape(b, m, h)        # (B, M, H)
    cls_upd = cls + jnp.sum(attn[:, :, None] * mem_val, axis=1)     # sentence[:,0,:] += ...

    # ---- action/state projection + Tanh + LayerNorm ----
    act = act_ref[...]                                              # (B, A)
    sa_in = jnp.concatenate([cls_upd, act], axis=-1)                # (B, H+A)
    swa = jnp.tanh(_mm(sa_in, wasp_ref[...]) + bh[0:1, :])          # (B, H)
    swa = _layernorm(swa, lng[0:1, :], lnb[0:1, :])

    # drop_env (nn.Dropout on cand_feats[..., :-A]) is identity in eval mode.
    # TODO(synk): self.vln_bert is an external pretrained OSCAR/LXMERT
    # cross-modal encoder with no clean Pallas equivalent; below is a
    # lightweight in-kernel surrogate reusing the module's own img_projection /
    # cand_LayerNorm parameters to produce h_t, logit, attended_language and
    # attended_visual with the correct shapes.
    cand2 = cand_ref[...]                                           # (B*C, F) bf16
    c = cand2.shape[0] // b
    vis = _mm(cand2, wimg_ref[...]) + bh[1:2, :]                    # (B*C, H)
    vis = _layernorm(vis, lng[1:2, :], lnb[1:2, :]).reshape(b, c, h)

    h_t = swa                                                       # (B, H)
    inv_sqrt_h = 1.0 / (float(h) ** 0.5)
    logits = jnp.sum(h_t[:, None, :] * vis, axis=-1) * inv_sqrt_h   # (B, C)
    attended_visual = jnp.sum(_softmax(logits)[:, :, None] * vis, axis=1)     # (B, H)
    lang_scores = jnp.sum(h_t[:, None, :] * rest, axis=-1) * inv_sqrt_h       # (B, L-1)
    attended_language = jnp.sum(_softmax(lang_scores)[:, :, None] * rest, axis=1)

    # ---- vis-lang fusion + state projection (exact per PyTorch) ----
    vl = _layernorm(attended_language * attended_visual, lng[2:3, :], lnb[2:3, :])
    sp_in = jnp.concatenate([h_t, vl], axis=-1)                     # (B, 2H)
    sp = _mm(sp_in, wsp_ref[...]) + bh[2:3, :]                      # (B, H)
    sp = _layernorm(sp, lng[3:4, :], lnb[3:4, :])

    # The in-place sentence[:,0,:] update is a side effect the PyTorch module
    # never returns; only (state_proj, logit) are emitted, packed lane-dense.
    pad = jnp.zeros((b, OUT_W - h - logits.shape[-1]), jnp.float32)
    out_ref[...] = jnp.concatenate([sp, logits, pad], axis=-1)      # (B, 128)


# ---------------- parameter init (deterministic, synthetic) ----------------
def init_params(key):
    def lin(k, fan_in, fan_out, bias=True):
        w = jax.random.normal(k, (fan_in, fan_out), jnp.float32) * 0.02
        if bias:
            return w, jnp.zeros((1, fan_out), jnp.float32)
        return (w,)

    keys = jax.random.split(key, 6)
    p = {}
    p["wq"], p["bq"] = lin(keys[0], 2 * H, 2 * H)          # memory_query
    p["wk"], p["bk"] = lin(keys[1], 2 * H, 2 * H)          # memory_key
    (p["wv"],) = lin(keys[2], H, H, bias=False)            # memory_value
    p["wasp"], p["basp"] = lin(keys[3], H + A, H)          # action_state_project
    p["wimg"], p["bimg"] = lin(keys[4], F, H)              # img_projection
    p["wsp"], p["bsp"] = lin(keys[5], 2 * H, H)            # state_proj
    for name in ("act", "cand", "vl", "st"):               # BertLayerNorms
        p["g_" + name] = jnp.ones((1, H), jnp.float32)
        p["b_" + name] = jnp.zeros((1, H), jnp.float32)
    return p


# ---------------- wrapper ----------------
def vlnbert_visual(sentence, action_feats, cand_feats, memory_feats, params):
    bx, l, h = sentence.shape
    c = cand_feats.shape[1]
    m = memory_feats.shape[1]
    assert h + c <= OUT_W

    # Free host-side reshapes / casts: 2-D matmul operands, bf16 halves DMA.
    cand2 = cand_feats.reshape(bx * c, cand_feats.shape[-1]).astype(jnp.bfloat16)
    mem2 = memory_feats.reshape(bx * m, memory_feats.shape[-1]).astype(jnp.bfloat16)

    wq = params["wq"].astype(jnp.bfloat16)
    wk = params["wk"].astype(jnp.bfloat16)
    wv = params["wv"].astype(jnp.bfloat16)
    wasp = params["wasp"].astype(jnp.bfloat16)
    wimg = params["wimg"].astype(jnp.bfloat16)
    wsp = params["wsp"].astype(jnp.bfloat16)

    # Pack small params to cut the input count (fewer DMA descriptors/buffers).
    b2h = jnp.concatenate([params["bq"], params["bk"]], axis=0)                   # (2, 2H)
    bh = jnp.concatenate([params["basp"], params["bimg"], params["bsp"]], axis=0)  # (3, H)
    lng = jnp.concatenate([params["g_act"], params["g_cand"],
                           params["g_vl"], params["g_st"]], axis=0)               # (4, H)
    lnb = jnp.concatenate([params["b_act"], params["b_cand"],
                           params["b_vl"], params["b_st"]], axis=0)               # (4, H)

    def full2(arr):
        return pl.BlockSpec(arr.shape, lambda i: (0, 0))

    def full3(arr):
        return pl.BlockSpec(arr.shape, lambda i: (0, 0, 0))

    inputs = [sentence, action_feats, cand2, mem2,
              wq, wk, wv, wasp, wimg, wsp, b2h, bh, lng, lnb]
    in_specs = [full3(sentence), full2(action_feats), full2(cand2), full2(mem2)] + \
               [full2(x) for x in inputs[4:]]

    grid_spec = pltpu.PrefetchScalarGridSpec(
        num_scalar_prefetch=0,
        grid=(1,),                                    # whole batch in one step
        in_specs=in_specs,
        out_specs=pl.BlockSpec((bx, OUT_W), lambda i: (0, 0)),
    )
    slab = pl.pallas_call(
        vlnbert_visual_kernel,
        out_shape=jax.ShapeDtypeStruct((bx, OUT_W), jnp.float32),
        grid_spec=grid_spec,
        compiler_params=pltpu.CompilerParams(
            dimension_semantics=("parallel",)),
    )(*inputs)

    state_proj = slab[:, :h]
    logit = slab[:, h:h + c]
    return state_proj, logit


if __name__ == "__main__":
    key = jax.random.PRNGKey(0)
    k1, k2, k3, k4, kp = jax.random.split(key, 5)
    sentence = jax.random.normal(k1, (B, L, H), jnp.float32)
    action_feats = jax.random.normal(k2, (B, A), jnp.float32)
    cand_feats = jax.random.normal(k3, (B, C, F), jnp.float32)
    memory_feats = jax.random.normal(k4, (B, M, 2 * H), jnp.float32)
    params = init_params(kp)

    state_proj, logit = vlnbert_visual(sentence, action_feats, cand_feats,
                                       memory_feats, params)
    jax.block_until_ready((state_proj, logit))
    assert state_proj.shape == (B, H) and logit.shape == (B, C)
    print("KERNEL_OK")
</pallas_src>

<mosaic_0001>
module attributes {stable_mosaic.version = 11 : i64} {
  func.func @vlnbert_visual_kernel(%arg0: i32, %arg1: memref<2x8x32xf32, #tpu.memory_space<vmem>>, %arg2: memref<2x8xf32, #tpu.memory_space<vmem>>, %arg3: memref<8x64xbf16, #tpu.memory_space<vmem>>, %arg4: memref<8x64xbf16, #tpu.memory_space<vmem>>, %arg5: memref<64x64xbf16, #tpu.memory_space<vmem>>, %arg6: memref<64x64xbf16, #tpu.memory_space<vmem>>, %arg7: memref<32x32xbf16, #tpu.memory_space<vmem>>, %arg8: memref<40x32xbf16, #tpu.memory_space<vmem>>, %arg9: memref<64x32xbf16, #tpu.memory_space<vmem>>, %arg10: memref<64x32xbf16, #tpu.memory_space<vmem>>, %arg11: memref<2x64xf32, #tpu.memory_space<vmem>>, %arg12: memref<3x32xf32, #tpu.memory_space<vmem>>, %arg13: memref<4x32xf32, #tpu.memory_space<vmem>>, %arg14: memref<4x32xf32, #tpu.memory_space<vmem>>, %arg15: memref<2x128xf32, #tpu.memory_space<vmem>>) attributes {dimension_semantics = [#tpu.dimension_semantics<parallel>], iteration_bounds = array<i64: 1>, scalar_prefetch = 0 : i64, scratch_operands = 0 : i64, tpu.core_type = #tpu.core_type<tc>, window_params = [{pipeline_mode = #tpu.pipeline_mode<synchronous>, transform_indices = @transform_0, window_bounds = array<i64: 2, 8, 32>}, {pipeline_mode = #tpu.pipeline_mode<synchronous>, transform_indices = @transform_1, window_bounds = array<i64: 2, 8>}, {pipeline_mode = #tpu.pipeline_mode<synchronous>, transform_indices = @transform_2, window_bounds = array<i64: 8, 64>}, {pipeline_mode = #tpu.pipeline_mode<synchronous>, transform_indices = @transform_3, window_bounds = array<i64: 8, 64>}, {pipeline_mode = #tpu.pipeline_mode<synchronous>, transform_indices = @transform_4, window_bounds = array<i64: 64, 64>}, {pipeline_mode = #tpu.pipeline_mode<synchronous>, transform_indices = @transform_5, window_bounds = array<i64: 64, 64>}, {pipeline_mode = #tpu.pipeline_mode<synchronous>, transform_indices = @transform_6, window_bounds = array<i64: 32, 32>}, {pipeline_mode = #tpu.pipeline_mode<synchronous>, transform_indices = @transform_7, window_bounds = array<i64: 40, 32>}, {pipeline_mode = #tpu.pipeline_mode<synchronous>, transform_indices = @transform_8, window_bounds = array<i64: 64, 32>}, {pipeline_mode = #tpu.pipeline_mode<synchronous>, transform_indices = @transform_9, window_bounds = array<i64: 64, 32>}, {pipeline_mode = #tpu.pipeline_mode<synchronous>, transform_indices = @transform_10, window_bounds = array<i64: 2, 64>}, {pipeline_mode = #tpu.pipeline_mode<synchronous>, transform_indices = @transform_11, window_bounds = array<i64: 3, 32>}, {pipeline_mode = #tpu.pipeline_mode<synchronous>, transform_indices = @transform_12, window_bounds = array<i64: 4, 32>}, {pipeline_mode = #tpu.pipeline_mode<synchronous>, transform_indices = @transform_13, window_bounds = array<i64: 4, 32>}, {pipeline_mode = #tpu.pipeline_mode<synchronous>, transform_indices = @transform_14, window_bounds = array<i64: 2, 128>}]} {
    %c0 = arith.constant 0 : index
    %c0_0 = arith.constant 0 : index
    %c0_1 = arith.constant 0 : index
    %0 = vector.load %arg1[%c0, %c0_0, %c0_1] : memref<2x8x32xf32, #tpu.memory_space<vmem>>, vector<2x8x32xf32>
    %1 = vector.extract_strided_slice %0 {offsets = [0, 0, 0], sizes = [2, 1, 32], strides = [1, 1, 1]} : vector<2x8x32xf32> to vector<2x1x32xf32>
    %2 = vector.shape_cast %1 : vector<2x1x32xf32> to vector<2x32xf32>
    %3 = vector.extract_strided_slice %0 {offsets = [0, 1, 0], sizes = [2, 7, 32], strides = [1, 1, 1]} : vector<2x8x32xf32> to vector<2x7x32xf32>
    %cst = arith.constant dense<0.000000e+00> : vector<2x32xf32>
    %4 = vector.multi_reduction <add>, %3, %cst [1] : vector<2x7x32xf32> to vector<2x32xf32>
    %c0_2 = arith.constant 0 : index
    %c0_3 = arith.constant 0 : index
    %5 = vector.load %arg11[%c0_2, %c0_3] : memref<2x64xf32, #tpu.memory_space<vmem>>, vector<2x64xf32>
    %c0_4 = arith.constant 0 : index
    %c0_5 = arith.constant 0 : index
    %6 = vector.load %arg12[%c0_4, %c0_5] : memref<3x32xf32, #tpu.memory_space<vmem>>, vector<3x32xf32>
    %c0_6 = arith.constant 0 : index
    %c0_7 = arith.constant 0 : index
    %7 = vector.load %arg13[%c0_6, %c0_7] : memref<4x32xf32, #tpu.memory_space<vmem>>, vector<4x32xf32>
    %c0_8 = arith.constant 0 : index
    %c0_9 = arith.constant 0 : index
    %8 = vector.load %arg14[%c0_8, %c0_9] : memref<4x32xf32, #tpu.memory_space<vmem>>, vector<4x32xf32>
    %9 = tpu.concatenate %2, %4 in 1 : vector<2x32xf32>, vector<2x32xf32> -> vector<2x64xf32>
    %c0_10 = arith.constant 0 : index
    %c0_11 = arith.constant 0 : index
    %10 = vector.load %arg5[%c0_10, %c0_11] : memref<64x64xbf16, #tpu.memory_space<vmem>>, vector<64x64xbf16>
    %11 = arith.truncf %9 : vector<2x64xf32> to vector<2x64xbf16>
    %cst_12 = arith.constant dense<0.000000e+00> : vector<2x64xf32>
    %12 = tpu.matmul %11, %10, %cst_12 {dimension_numbers = #tpu.dot_dimension_numbers<[1], [0], [0], [1], [0, 0, 1, 1], [], []>} : vector<2x64xbf16>, vector<64x64xbf16>, vector<2x64xf32> -> vector<2x64xf32>
    %13 = vector.extract_strided_slice %5 {offsets = [0, 0], sizes = [1, 64], strides = [1, 1]} : vector<2x64xf32> to vector<1x64xf32>
    %14 = vector.broadcast %13 : vector<1x64xf32> to vector<2x64xf32>
    %15 = arith.addf %12, %14 : vector<2x64xf32>
    %c0_13 = arith.constant 0 : index
    %c0_14 = arith.constant 0 : index
    %16 = vector.load %arg4[%c0_13, %c0_14] : memref<8x64xbf16, #tpu.memory_space<vmem>>, vector<8x64xbf16>
    %c0_15 = arith.constant 0 : index
    %c0_16 = arith.constant 0 : index
    %17 = vector.load %arg6[%c0_15, %c0_16] : memref<64x64xbf16, #tpu.memory_space<vmem>>, vector<64x64xbf16>
    %cst_17 = arith.constant dense<0.000000e+00> : vector<8x64xf32>
    %18 = tpu.matmul %16, %17, %cst_17 {dimension_numbers = #tpu.dot_dimension_numbers<[1], [0], [0], [1], [0, 0, 1, 1], [], []>} : vector<8x64xbf16>, vector<64x64xbf16>, vector<8x64xf32> -> vector<8x64xf32>
    %19 = vector.extract_strided_slice %5 {offsets = [1, 0], sizes = [1, 64], strides = [1, 1]} : vector<2x64xf32> to vector<1x64xf32>
    %20 = vector.broadcast %19 : vector<1x64xf32> to vector<8x64xf32>
    %21 = arith.addf %18, %20 : vector<8x64xf32>
    %22 = vector.shape_cast %21 : vector<8x64xf32> to vector<2x4x64xf32>
    %23 = vector.shape_cast %15 : vector<2x64xf32> to vector<2x1x64xf32>
    %24 = vector.broadcast %23 : vector<2x1x64xf32> to vector<2x4x64xf32>
    %25 = arith.mulf %24, %22 : vector<2x4x64xf32>
    %cst_18 = arith.constant dense<0.000000e+00> : vector<2x4xf32>
    %26 = vector.multi_reduction <add>, %25, %cst_18 [2] : vector<2x4x64xf32> to vector<2x4xf32>
    %cst_19 = arith.constant dense<0xFF800000> : vector<2xf32>
    %27 = vector.multi_reduction <maximumf>, %26, %cst_19 [1] : vector<2x4xf32> to vector<2xf32>
    %28 = vector.shape_cast %27 : vector<2xf32> to vector<2x1xf32>
    %29 = vector.broadcast %28 : vector<2x1xf32> to vector<2x4xf32>
    %30 = arith.subf %26, %29 : vector<2x4xf32>
    %31 = math.exp %30 : vector<2x4xf32>
    %cst_20 = arith.constant dense<0.000000e+00> : vector<2xf32>
    %32 = vector.multi_reduction <add>, %31, %cst_20 [1] : vector<2x4xf32> to vector<2xf32>
    %33 = vector.shape_cast %32 : vector<2xf32> to vector<2x1xf32>
    %34 = tpu.reciprocal %33 {approx = true} : vector<2x1xf32> -> vector<2x1xf32>
    %35 = vector.broadcast %34 : vector<2x1xf32> to vector<2x4xf32>
    %36 = arith.mulf %31, %35 : vector<2x4xf32>
    %37 = vector.extract_strided_slice %16 {offsets = [0, 0], sizes = [8, 32], strides = [1, 1]} : vector<8x64xbf16> to vector<8x32xbf16>
    %c0_21 = arith.constant 0 : index
    %c0_22 = arith.constant 0 : index
    %38 = vector.load %arg7[%c0_21, %c0_22] : memref<32x32xbf16, #tpu.memory_space<vmem>>, vector<32x32xbf16>
    %cst_23 = arith.constant dense<0.000000e+00> : vector<8x32xf32>
    %39 = tpu.matmul %37, %38, %cst_23 {dimension_numbers = #tpu.dot_dimension_numbers<[1], [0], [0], [1], [0, 0, 1, 1], [], []>} : vector<8x32xbf16>, vector<32x32xbf16>, vector<8x32xf32> -> vector<8x32xf32>
    %40 = vector.shape_cast %39 : vector<8x32xf32> to vector<2x4x32xf32>
    %41 = vector.shape_cast %36 : vector<2x4xf32> to vector<2x4x1xf32>
    %42 = vector.broadcast %41 : vector<2x4x1xf32> to vector<2x4x32xf32>
    %43 = arith.mulf %42, %40 : vector<2x4x32xf32>
    %cst_24 = arith.constant dense<0.000000e+00> : vector<2x32xf32>
    %44 = vector.multi_reduction <add>, %43, %cst_24 [1] : vector<2x4x32xf32> to vector<2x32xf32>
    %45 = arith.addf %2, %44 : vector<2x32xf32>
    %c0_25 = arith.constant 0 : index
    %c0_26 = arith.constant 0 : index
    %46 = vector.load %arg2[%c0_25, %c0_26] : memref<2x8xf32, #tpu.memory_space<vmem>>, vector<2x8xf32>
    %47 = tpu.concatenate %45, %46 in 1 : vector<2x32xf32>, vector<2x8xf32> -> vector<2x40xf32>
    %c0_27 = arith.constant 0 : index
    %c0_28 = arith.constant 0 : index
    %48 = vector.load %arg8[%c0_27, %c0_28] : memref<40x32xbf16, #tpu.memory_space<vmem>>, vector<40x32xbf16>
    %49 = arith.truncf %47 : vector<2x40xf32> to vector<2x40xbf16>
    %cst_29 = arith.constant dense<0.000000e+00> : vector<2x32xf32>
    %50 = tpu.matmul %49, %48, %cst_29 {dimension_numbers = #tpu.dot_dimension_numbers<[1], [0], [0], [1], [0, 0, 1, 1], [], []>} : vector<2x40xbf16>, vector<40x32xbf16>, vector<2x32xf32> -> vector<2x32xf32>
    %51 = vector.extract_strided_slice %6 {offsets = [0, 0], sizes = [1, 32], strides = [1, 1]} : vector<3x32xf32> to vector<1x32xf32>
    %52 = vector.broadcast %51 : vector<1x32xf32> to vector<2x32xf32>
    %53 = arith.addf %50, %52 : vector<2x32xf32>
    %54 = math.tanh %53 : vector<2x32xf32>
    %55 = vector.extract_strided_slice %7 {offsets = [0, 0], sizes = [1, 32], strides = [1, 1]} : vector<4x32xf32> to vector<1x32xf32>
    %56 = vector.extract_strided_slice %8 {offsets = [0, 0], sizes = [1, 32], strides = [1, 1]} : vector<4x32xf32> to vector<1x32xf32>
    %cst_30 = arith.constant dense<0.000000e+00> : vector<2xf32>
    %57 = vector.multi_reduction <add>, %54, %cst_30 [1] : vector<2x32xf32> to vector<2xf32>
    %58 = vector.shape_cast %57 : vector<2xf32> to vector<2x1xf32>
    %cst_31 = arith.constant 3.200000e+01 : f32
    %59 = vector.broadcast %cst_31 : f32 to vector<2x1xf32>
    %60 = arith.divf %58, %59 : vector<2x1xf32>
    %61 = vector.broadcast %60 : vector<2x1xf32> to vector<2x32xf32>
    %62 = arith.subf %54, %61 : vector<2x32xf32>
    %63 = arith.mulf %62, %62 : vector<2x32xf32>
    %cst_32 = arith.constant dense<0.000000e+00> : vector<2xf32>
    %64 = vector.multi_reduction <add>, %63, %cst_32 [1] : vector<2x32xf32> to vector<2xf32>
    %65 = vector.shape_cast %64 : vector<2xf32> to vector<2x1xf32>
    %cst_33 = arith.constant 3.200000e+01 : f32
    %66 = vector.broadcast %cst_33 : f32 to vector<2x1xf32>
    %67 = arith.divf %65, %66 : vector<2x1xf32>
    %68 = vector.broadcast %60 : vector<2x1xf32> to vector<2x32xf32>
    %69 = arith.subf %54, %68 : vector<2x32xf32>
    %cst_34 = arith.constant 9.99999996E-13 : f32
    %70 = vector.broadcast %cst_34 : f32 to vector<2x1xf32>
    %71 = arith.addf %67, %70 : vector<2x1xf32>
    %72 = math.rsqrt %71 : vector<2x1xf32>
    %73 = vector.broadcast %72 : vector<2x1xf32> to vector<2x32xf32>
    %74 = arith.mulf %69, %73 : vector<2x32xf32>
    %75 = vector.broadcast %55 : vector<1x32xf32> to vector<2x32xf32>
    %76 = arith.mulf %75, %74 : vector<2x32xf32>
    %77 = vector.broadcast %56 : vector<1x32xf32> to vector<2x32xf32>
    %78 = arith.addf %76, %77 : vector<2x32xf32>
    %c0_35 = arith.constant 0 : index
    %c0_36 = arith.constant 0 : index
    %79 = vector.load %arg3[%c0_35, %c0_36] : memref<8x64xbf16, #tpu.memory_space<vmem>>, vector<8x64xbf16>
    %c0_37 = arith.constant 0 : index
    %c0_38 = arith.constant 0 : index
    %80 = vector.load %arg9[%c0_37, %c0_38] : memref<64x32xbf16, #tpu.memory_space<vmem>>, vector<64x32xbf16>
    %cst_39 = arith.constant dense<0.000000e+00> : vector<8x32xf32>
    %81 = tpu.matmul %79, %80, %cst_39 {dimension_numbers = #tpu.dot_dimension_numbers<[1], [0], [0], [1], [0, 0, 1, 1], [], []>} : vector<8x64xbf16>, vector<64x32xbf16>, vector<8x32xf32> -> vector<8x32xf32>
    %82 = vector.extract_strided_slice %6 {offsets = [1, 0], sizes = [1, 32], strides = [1, 1]} : vector<3x32xf32> to vector<1x32xf32>
    %83 = vector.broadcast %82 : vector<1x32xf32> to vector<8x32xf32>
    %84 = arith.addf %81, %83 : vector<8x32xf32>
    %85 = vector.extract_strided_slice %7 {offsets = [1, 0], sizes = [1, 32], strides = [1, 1]} : vector<4x32xf32> to vector<1x32xf32>
    %86 = vector.extract_strided_slice %8 {offsets = [1, 0], sizes = [1, 32], strides = [1, 1]} : vector<4x32xf32> to vector<1x32xf32>
    %cst_40 = arith.constant dense<0.000000e+00> : vector<8xf32>
    %87 = vector.multi_reduction <add>, %84, %cst_40 [1] : vector<8x32xf32> to vector<8xf32>
    %88 = vector.shape_cast %87 : vector<8xf32> to vector<8x1xf32>
    %cst_41 = arith.constant 3.200000e+01 : f32
    %89 = vector.broadcast %cst_41 : f32 to vector<8x1xf32>
    %90 = arith.divf %88, %89 : vector<8x1xf32>
    %91 = vector.broadcast %90 : vector<8x1xf32> to vector<8x32xf32>
    %92 = arith.subf %84, %91 : vector<8x32xf32>
    %93 = arith.mulf %92, %92 : vector<8x32xf32>
    %cst_42 = arith.constant dense<0.000000e+00> : vector<8xf32>
    %94 = vector.multi_reduction <add>, %93, %cst_42 [1] : vector<8x32xf32> to vector<8xf32>
    %95 = vector.shape_cast %94 : vector<8xf32> to vector<8x1xf32>
    %cst_43 = arith.constant 3.200000e+01 : f32
    %96 = vector.broadcast %cst_43 : f32 to vector<8x1xf32>
    %97 = arith.divf %95, %96 : vector<8x1xf32>
    %98 = vector.broadcast %90 : vector<8x1xf32> to vector<8x32xf32>
    %99 = arith.subf %84, %98 : vector<8x32xf32>
    %cst_44 = arith.constant 9.99999996E-13 : f32
    %100 = vector.broadcast %cst_44 : f32 to vector<8x1xf32>
    %101 = arith.addf %97, %100 : vector<8x1xf32>
    %102 = math.rsqrt %101 : vector<8x1xf32>
    %103 = vector.broadcast %102 : vector<8x1xf32> to vector<8x32xf32>
    %104 = arith.mulf %99, %103 : vector<8x32xf32>
    %105 = vector.broadcast %85 : vector<1x32xf32> to vector<8x32xf32>
    %106 = arith.mulf %105, %104 : vector<8x32xf32>
    %107 = vector.broadcast %86 : vector<1x32xf32> to vector<8x32xf32>
    %108 = arith.addf %106, %107 : vector<8x32xf32>
    %109 = vector.shape_cast %108 : vector<8x32xf32> to vector<2x4x32xf32>
    %110 = vector.shape_cast %78 : vector<2x32xf32> to vector<2x1x32xf32>
    %111 = vector.broadcast %110 : vector<2x1x32xf32> to vector<2x4x32xf32>
    %112 = arith.mulf %111, %109 : vector<2x4x32xf32>
    %cst_45 = arith.constant dense<0.000000e+00> : vector<2x4xf32>
    %113 = vector.multi_reduction <add>, %112, %cst_45 [2] : vector<2x4x32xf32> to vector<2x4xf32>
    %cst_46 = arith.constant 0.176776692 : f32
    %114 = vector.broadcast %cst_46 : f32 to vector<2x4xf32>
    %115 = arith.mulf %113, %114 : vector<2x4xf32>
    %cst_47 = arith.constant dense<0xFF800000> : vector<2xf32>
    %116 = vector.multi_reduction <maximumf>, %115, %cst_47 [1] : vector<2x4xf32> to vector<2xf32>
    %117 = vector.shape_cast %116 : vector<2xf32> to vector<2x1xf32>
    %118 = vector.broadcast %117 : vector<2x1xf32> to vector<2x4xf32>
    %119 = arith.subf %115, %118 : vector<2x4xf32>
    %120 = math.exp %119 : vector<2x4xf32>
    %cst_48 = arith.constant dense<0.000000e+00> : vector<2xf32>
    %121 = vector.multi_reduction <add>, %120, %cst_48 [1] : vector<2x4xf32> to vector<2xf32>
    %122 = vector.shape_cast %121 : vector<2xf32> to vector<2x1xf32>
    %123 = tpu.reciprocal %122 {approx = true} : vector<2x1xf32> -> vector<2x1xf32>
    %124 = vector.broadcast %123 : vector<2x1xf32> to vector<2x4xf32>
    %125 = arith.mulf %120, %124 : vector<2x4xf32>
    %126 = vector.shape_cast %125 : vector<2x4xf32> to vector<2x4x1xf32>
    %127 = vector.broadcast %126 : vector<2x4x1xf32> to vector<2x4x32xf32>
    %128 = arith.mulf %127, %109 : vector<2x4x32xf32>
    %cst_49 = arith.constant dense<0.000000e+00> : vector<2x32xf32>
    %129 = vector.multi_reduction <add>, %128, %cst_49 [1] : vector<2x4x32xf32> to vector<2x32xf32>
    %130 = vector.shape_cast %78 : vector<2x32xf32> to vector<2x1x32xf32>
    %131 = vector.broadcast %130 : vector<2x1x32xf32> to vector<2x7x32xf32>
    %132 = arith.mulf %131, %3 : vector<2x7x32xf32>
    %cst_50 = arith.constant dense<0.000000e+00> : vector<2x7xf32>
    %133 = vector.multi_reduction <add>, %132, %cst_50 [2] : vector<2x7x32xf32> to vector<2x7xf32>
    %cst_51 = arith.constant 0.176776692 : f32
    %134 = vector.broadcast %cst_51 : f32 to vector<2x7xf32>
    %135 = arith.mulf %133, %134 : vector<2x7xf32>
    %cst_52 = arith.constant dense<0xFF800000> : vector<2xf32>
    %136 = vector.multi_reduction <maximumf>, %135, %cst_52 [1] : vector<2x7xf32> to vector<2xf32>
    %137 = vector.shape_cast %136 : vector<2xf32> to vector<2x1xf32>
    %138 = vector.broadcast %137 : vector<2x1xf32> to vector<2x7xf32>
    %139 = arith.subf %135, %138 : vector<2x7xf32>
    %140 = math.exp %139 : vector<2x7xf32>
    %cst_53 = arith.constant dense<0.000000e+00> : vector<2xf32>
    %141 = vector.multi_reduction <add>, %140, %cst_53 [1] : vector<2x7xf32> to vector<2xf32>
    %142 = vector.shape_cast %141 : vector<2xf32> to vector<2x1xf32>
    %143 = tpu.reciprocal %142 {approx = true} : vector<2x1xf32> -> vector<2x1xf32>
    %144 = vector.broadcast %143 : vector<2x1xf32> to vector<2x7xf32>
    %145 = arith.mulf %140, %144 : vector<2x7xf32>
    %146 = vector.shape_cast %145 : vector<2x7xf32> to vector<2x7x1xf32>
    %147 = vector.broadcast %146 : vector<2x7x1xf32> to vector<2x7x32xf32>
    %148 = arith.mulf %147, %3 : vector<2x7x32xf32>
    %cst_54 = arith.constant dense<0.000000e+00> : vector<2x32xf32>
    %149 = vector.multi_reduction <add>, %148, %cst_54 [1] : vector<2x7x32xf32> to vector<2x32xf32>
    %150 = arith.mulf %149, %129 : vector<2x32xf32>
    %151 = vector.extract_strided_slice %7 {offsets = [2, 0], sizes = [1, 32], strides = [1, 1]} : vector<4x32xf32> to vector<1x32xf32>
    %152 = vector.extract_strided_slice %8 {offsets = [2, 0], sizes = [1, 32], strides = [1, 1]} : vector<4x32xf32> to vector<1x32xf32>
    %cst_55 = arith.constant dense<0.000000e+00> : vector<2xf32>
    %153 = vector.multi_reduction <add>, %150, %cst_55 [1] : vector<2x32xf32> to vector<2xf32>
    %154 = vector.shape_cast %153 : vector<2xf32> to vector<2x1xf32>
    %cst_56 = arith.constant 3.200000e+01 : f32
    %155 = vector.broadcast %cst_56 : f32 to vector<2x1xf32>
    %156 = arith.divf %154, %155 : vector<2x1xf32>
    %157 = vector.broadcast %156 : vector<2x1xf32> to vector<2x32xf32>
    %158 = arith.subf %150, %157 : vector<2x32xf32>
    %159 = arith.mulf %158, %158 : vector<2x32xf32>
    %cst_57 = arith.constant dense<0.000000e+00> : vector<2xf32>
    %160 = vector.multi_reduction <add>, %159, %cst_57 [1] : vector<2x32xf32> to vector<2xf32>
    %161 = vector.shape_cast %160 : vector<2xf32> to vector<2x1xf32>
    %cst_58 = arith.constant 3.200000e+01 : f32
    %162 = vector.broadcast %cst_58 : f32 to vector<2x1xf32>
    %163 = arith.divf %161, %162 : vector<2x1xf32>
    %164 = vector.broadcast %156 : vector<2x1xf32> to vector<2x32xf32>
    %165 = arith.subf %150, %164 : vector<2x32xf32>
    %cst_59 = arith.constant 9.99999996E-13 : f32
    %166 = vector.broadcast %cst_59 : f32 to vector<2x1xf32>
    %167 = arith.addf %163, %166 : vector<2x1xf32>
    %168 = math.rsqrt %167 : vector<2x1xf32>
    %169 = vector.broadcast %168 : vector<2x1xf32> to vector<2x32xf32>
    %170 = arith.mulf %165, %169 : vector<2x32xf32>
    %171 = vector.broadcast %151 : vector<1x32xf32> to vector<2x32xf32>
    %172 = arith.mulf %171, %170 : vector<2x32xf32>
    %173 = vector.broadcast %152 : vector<1x32xf32> to vector<2x32xf32>
    %174 = arith.addf %172, %173 : vector<2x32xf32>
    %175 = tpu.concatenate %78, %174 in 1 : vector<2x32xf32>, vector<2x32xf32> -> vector<2x64xf32>
    %c0_60 = arith.constant 0 : index
    %c0_61 = arith.constant 0 : index
    %176 = vector.load %arg10[%c0_60, %c0_61] : memref<64x32xbf16, #tpu.memory_space<vmem>>, vector<64x32xbf16>
    %177 = arith.truncf %175 : vector<2x64xf32> to vector<2x64xbf16>
    %cst_62 = arith.constant dense<0.000000e+00> : vector<2x32xf32>
    %178 = tpu.matmul %177, %176, %cst_62 {dimension_numbers = #tpu.dot_dimension_numbers<[1], [0], [0], [1], [0, 0, 1, 1], [], []>} : vector<2x64xbf16>, vector<64x32xbf16>, vector<2x32xf32> -> vector<2x32xf32>
    %179 = vector.extract_strided_slice %6 {offsets = [2, 0], sizes = [1, 32], strides = [1, 1]} : vector<3x32xf32> to vector<1x32xf32>
    %180 = vector.broadcast %179 : vector<1x32xf32> to vector<2x32xf32>
    %181 = arith.addf %178, %180 : vector<2x32xf32>
    %182 = vector.extract_strided_slice %7 {offsets = [3, 0], sizes = [1, 32], strides = [1, 1]} : vector<4x32xf32> to vector<1x32xf32>
    %183 = vector.extract_strided_slice %8 {offsets = [3, 0], sizes = [1, 32], strides = [1, 1]} : vector<4x32xf32> to vector<1x32xf32>
    %cst_63 = arith.constant dense<0.000000e+00> : vector<2xf32>
    %184 = vector.multi_reduction <add>, %181, %cst_63 [1] : vector<2x32xf32> to vector<2xf32>
    %185 = vector.shape_cast %184 : vector<2xf32> to vector<2x1xf32>
    %cst_64 = arith.constant 3.200000e+01 : f32
    %186 = vector.broadcast %cst_64 : f32 to vector<2x1xf32>
    %187 = arith.divf %185, %186 : vector<2x1xf32>
    %188 = vector.broadcast %187 : vector<2x1xf32> to vector<2x32xf32>
    %189 = arith.subf %181, %188 : vector<2x32xf32>
    %190 = arith.mulf %189, %189 : vector<2x32xf32>
    %cst_65 = arith.constant dense<0.000000e+00> : vector<2xf32>
    %191 = vector.multi_reduction <add>, %190, %cst_65 [1] : vector<2x32xf32> to vector<2xf32>
    %192 = vector.shape_cast %191 : vector<2xf32> to vector<2x1xf32>
    %cst_66 = arith.constant 3.200000e+01 : f32
    %193 = vector.broadcast %cst_66 : f32 to vector<2x1xf32>
    %194 = arith.divf %192, %193 : vector<2x1xf32>
    %195 = vector.broadcast %187 : vector<2x1xf32> to vector<2x32xf32>
    %196 = arith.subf %181, %195 : vector<2x32xf32>
    %cst_67 = arith.constant 9.99999996E-13 : f32
    %197 = vector.broadcast %cst_67 : f32 to vector<2x1xf32>
    %198 = arith.addf %194, %197 : vector<2x1xf32>
    %199 = math.rsqrt %198 : vector<2x1xf32>
    %200 = vector.broadcast %199 : vector<2x1xf32> to vector<2x32xf32>
    %201 = arith.mulf %196, %200 : vector<2x32xf32>
    %202 = vector.broadcast %182 : vector<1x32xf32> to vector<2x32xf32>
    %203 = arith.mulf %202, %201 : vector<2x32xf32>
    %204 = vector.broadcast %183 : vector<1x32xf32> to vector<2x32xf32>
    %205 = arith.addf %203, %204 : vector<2x32xf32>
    %cst_68 = arith.constant 0.000000e+00 : f32
    %206 = vector.broadcast %cst_68 : f32 to vector<2x92xf32>
    %207 = tpu.concatenate %205, %115, %206 in 1 : vector<2x32xf32>, vector<2x4xf32>, vector<2x92xf32> -> vector<2x128xf32>
    %c0_69 = arith.constant 0 : index
    %c0_70 = arith.constant 0 : index
    %208 = vector.load %arg15[%c0_69, %c0_70] : memref<2x128xf32, #tpu.memory_space<vmem>>, vector<2x128xf32>
    tpu.vector_store %arg15[%c0_69, %c0_70], %207 {strides = array<i32>} : memref<2x128xf32, #tpu.memory_space<vmem>>, vector<2x128xf32>,
    return
  }
  func.func @transform_0(%arg0: i32) -> (i32, i32, i32) {
    %c0_i32 = arith.constant 0 : i32
    %c0_i32_0 = arith.constant 0 : i32
    %c0_i32_1 = arith.constant 0 : i32
    %c0_i32_2 = arith.constant 0 : i32
    return %c0_i32, %c0_i32_0, %c0_i32_1 : i32, i32, i32
  }
  func.func @transform_1(%arg0: i32) -> (i32, i32) {
    %c0_i32 = arith.constant 0 : i32
    %c0_i32_0 = arith.constant 0 : i32
    %c0_i32_1 = arith.constant 0 : i32
    return %c0_i32, %c0_i32_0 : i32, i32
  }
  func.func @transform_2(%arg0: i32) -> (i32, i32) {
    %c0_i32 = arith.constant 0 : i32
    %c0_i32_0 = arith.constant 0 : i32
    %c0_i32_1 = arith.constant 0 : i32
    return %c0_i32, %c0_i32_0 : i32, i32
  }
  func.func @transform_3(%arg0: i32) -> (i32, i32) {
    %c0_i32 = arith.constant 0 : i32
    %c0_i32_0 = arith.constant 0 : i32
    %c0_i32_1 = arith.constant 0 : i32
    return %c0_i32, %c0_i32_0 : i32, i32
  }
  func.func @transform_4(%arg0: i32) -> (i32, i32) {
    %c0_i32 = arith.constant 0 : i32
    %c0_i32_0 = arith.constant 0 : i32
    %c0_i32_1 = arith.constant 0 : i32
    return %c0_i32, %c0_i32_0 : i32, i32
  }
  func.func @transform_5(%arg0: i32) -> (i32, i32) {
    %c0_i32 = arith.constant 0 : i32
    %c0_i32_0 = arith.constant 0 : i32
    %c0_i32_1 = arith.constant 0 : i32
    return %c0_i32, %c0_i32_0 : i32, i32
  }
  func.func @transform_6(%arg0: i32) -> (i32, i32) {
    %c0_i32 = arith.constant 0 : i32
    %c0_i32_0 = arith.constant 0 : i32
    %c0_i32_1 = arith.constant 0 : i32
    return %c0_i32, %c0_i32_0 : i32, i32
  }
  func.func @transform_7(%arg0: i32) -> (i32, i32) {
    %c0_i32 = arith.constant 0 : i32
    %c0_i32_0 = arith.constant 0 : i32
    %c0_i32_1 = arith.constant 0 : i32
    return %c0_i32, %c0_i32_0 : i32, i32
  }
  func.func @transform_8(%arg0: i32) -> (i32, i32) {
    %c0_i32 = arith.constant 0 : i32
    %c0_i32_0 = arith.constant 0 : i32
    %c0_i32_1 = arith.constant 0 : i32
    return %c0_i32, %c0_i32_0 : i32, i32
  }
  func.func @transform_9(%arg0: i32) -> (i32, i32) {
    %c0_i32 = arith.constant 0 : i32
    %c0_i32_0 = arith.constant 0 : i32
    %c0_i32_1 = arith.constant 0 : i32
    return %c0_i32, %c0_i32_0 : i32, i32
  }
  func.func @transform_10(%arg0: i32) -> (i32, i32) {
    %c0_i32 = arith.constant 0 : i32
    %c0_i32_0 = arith.constant 0 : i32
    %c0_i32_1 = arith.constant 0 : i32
    return %c0_i32, %c0_i32_0 : i32, i32
  }
  func.func @transform_11(%arg0: i32) -> (i32, i32) {
    %c0_i32 = arith.constant 0 : i32
    %c0_i32_0 = arith.constant 0 : i32
    %c0_i32_1 = arith.constant 0 : i32
    return %c0_i32, %c0_i32_0 : i32, i32
  }
  func.func @transform_12(%arg0: i32) -> (i32, i32) {
    %c0_i32 = arith.constant 0 : i32
    %c0_i32_0 = arith.constant 0 : i32
    %c0_i32_1 = arith.constant 0 : i32
    return %c0_i32, %c0_i32_0 : i32, i32
  }
  func.func @transform_13(%arg0: i32) -> (i32, i32) {
    %c0_i32 = arith.constant 0 : i32
    %c0_i32_0 = arith.constant 0 : i32
    %c0_i32_1 = arith.constant 0 : i32
    return %c0_i32, %c0_i32_0 : i32, i32
  }
  func.func @transform_14(%arg0: i32) -> (i32, i32) {
    %c0_i32 = arith.constant 0 : i32
    %c0_i32_0 = arith.constant 0 : i32
    %c0_i32_1 = arith.constant 0 : i32
    return %c0_i32, %c0_i32_0 : i32, i32
  }
}

</mosaic_0001>

<bundles_post_ra>
// kernel: tpu_custom_call.1
= control target key start
LH: loop header
LB: loop body
LE: loop exit
PB: predicated region body
PF: predicated region fallthrough
CT: control target
= control target key end

     0   :  { %vm57_vm0 = vcmask 260096   ;;  %v1307_v4 = vmov 0.0   ;;  %vm1308_vm1 = vmmov 0   ;;  %vm77_vm2 = vcmask 1041409   ;;  %s1692_s0 = inlined_call_operand.vmem [shape: f32[2,8,32], index: 0, kind: input, shape index: {}]   ;;  %s1693_s1 = inlined_call_operand.vmem [shape: f32[2,8], index: 1, kind: input, shape index: {}]   ;;  %s1694_s2 = inlined_call_operand.vmem [shape: bf16[8,64], index: 2, kind: input, shape index: {}]   ;;  %s1695_s3 = inlined_call_operand.vmem [shape: bf16[8,64], index: 3, kind: input, shape index: {}]   ;;  %s1696_s4 = inlined_call_operand.vmem [shape: bf16[64,64], index: 4, kind: input, shape index: {}]   ;;  %s1697_s5 = inlined_call_operand.vmem [shape: bf16[64,64], index: 5, kind: input, shape index: {}]   ;;  %s1698_s6 = inlined_call_operand.vmem [shape: bf16[32,32], index: 6, kind: input, shape index: {}]   ;;  %s1699_s7 = inlined_call_operand.vmem [shape: bf16[40,32], index: 7, kind: input, shape index: {}]   ;;  %s1700_s8 = inlined_call_operand.vmem [shape: bf16[64,32], index: 8, kind: input, shape index: {}]   ;;  %s1701_s9 = inlined_call_operand.vmem [shape: bf16[64,32], index: 9, kind: input, shape index: {}]   ;;  %s1702_s10 = inlined_call_operand.vmem [shape: f32[2,64], index: 10, kind: input, shape index: {}]   ;;  %s1703_s11 = inlined_call_operand.vmem [shape: f32[3,32], index: 11, kind: input, shape index: {}]   ;;  %s1704_s12 = inlined_call_operand.vmem [shape: f32[4,32], index: 12, kind: input, shape index: {}]   ;;  %s1705_s13 = inlined_call_operand.vmem [shape: f32[4,32], index: 13, kind: input, shape index: {}]   ;;  %s1706_s14 = inlined_call_operand.hbm [shape: f32[2,128], index: 14, kind: output, shape index: {}]  }
   0x1   :  { %v1391_v0 = vld [vmem:[%s1692_s0] sm:$0xff]  ;;  %v1396_v1 = vld [vmem:[%s1692_s0 + $0x8] sm:$0xff]  ;;  %1160 = vmatprep.subr.bf16.mxu0 %v1307_v4  ;;  %1172 = vmatprep.subr.bf16.mxu1 %v1307_v4  ;;  %v1238_v17 = vld [vmem:[%s1696_s4 + $0x10] sm:$0xff]   ;;  %vm125_vm3 = vcmask 523264  }
   0x2   :  { %v53_v2 = vrot.slane %v1391_v0, 1  ;;  %v54_v3 = vrot.slane %v1396_v1, 1  ;;  %v1234_v5 = vld [vmem:[%s1696_s4] sm:$0xff]   ;;  %v1236_v9 = vld [vmem:[%s1696_s4 + $0x8] sm:$0xff]   ;;  %1168 = vmatprep.mubr.msk.bf16.mxu0 %vm1308_vm1, %v1307_v4  ;;  %1180 = vmatprep.mubr.msk.bf16.mxu1 %vm1308_vm1, %v1307_v4  ;;  %v1239_v18 = vld [vmem:[%s1697_s5 + $0x10] sm:$0xff]  }
   0x3   :  { %v1235_v8 = vld [vmem:[%s1697_s5] sm:$0xff]   ;;  %1161 = vmatpush3.bf16.msra.mxu0 %v1234_v5  ;;  %v1237_v12 = vld [vmem:[%s1697_s5 + $0x8] sm:$0xff]   ;;  %v1240_v23 = vld [vmem:[%s1696_s4 + $0x18] sm:$0xff]   ;;  %s1309_s4 = smov 32  }
   0x4   :  { %v58_v6 = vsel %vm57_vm0, %v53_v2, 0.0  ;;  %v65_v7 = vsel %vm57_vm0, %v54_v3, 0.0  ;;  %1162 = vmatprep.subr.bf16.mxu0 %v1307_v4  ;;  %1173 = vmatpush3.bf16.msra.mxu1 %v1235_v8  ;;  %v1241_v24 = vld [vmem:[%s1697_s5 + $0x18] sm:$0xff]   ;;  %v1441_v27 = vld [vmem:[%s1695_s3] sm:$0xf] }
   0x5   :  { %v59_v10 = vrot.slane %v58_v6, 4  ;;  %v66_v11 = vrot.slane %v65_v7, 4  ;;  %1174 = vmatprep.subr.bf16.mxu1 %v1307_v4 }
   0x7   :  { %v60_v13 = vadd.f32 %v59_v10, %v58_v6  ;;  %v67_v14 = vadd.f32 %v66_v11, %v65_v7  ;;  %1163 = vmatpush3.bf16.msra.mxu0 %v1236_v9 }
   0x8   :  { %1164 = vmatprep.subr.bf16.mxu0 %v1307_v4  ;;  %1175 = vmatpush3.bf16.msra.mxu1 %v1237_v12 }
   0x9   :  { %v61_v15 = vrot.slane %v60_v13, 2  ;;  %v68_v16 = vrot.slane %v67_v14, 2  ;;  %1176 = vmatprep.subr.bf16.mxu1 %v1307_v4 }
   0xb   :  { %v62_v19 = vadd.f32 %v61_v15, %v60_v13  ;;  %v69_v20 = vadd.f32 %v68_v16, %v67_v14  ;;  %1165 = vmatpush3.bf16.msra.mxu0 %v1238_v17 }
   0xc   :  { %1166 = vmatprep.subr.bf16.mxu0 %v1307_v4  ;;  %1177 = vmatpush3.bf16.msra.mxu1 %v1239_v18 }
   0xd   :  { %v63_v21 = vrot.slane %v62_v19, 1  ;;  %v70_v22 = vrot.slane %v69_v20, 1  ;;  %1178 = vmatprep.subr.bf16.mxu1 %v1307_v4 }
   0xf   :  { %v64_v25 = vadd.f32 %v63_v21, %v62_v19  ;;  %v71_v26 = vadd.f32 %v70_v22, %v69_v20  ;;  %1167 = vmatpush3.bf16.msra.mxu0 %v1240_v23 }
  0x10   :  { %1179 = vmatpush3.bf16.msra.mxu1 %v1241_v24  ;;  %1184 = vmatprep.subr.bf16.mxu0 %v1307_v4 }
  0x11   :  { %v82_v28 = vsel %vm77_vm2, %v71_v26, %v64_v25  ;;  %1192 = vmatprep.subr.bf16.mxu1 %v1307_v4 }
  0x12   :  { %83 = vrot.lane.b32.xlu0 %v82_v28, %s1309_s4 }
  0x13   :  { %19 = vsyncpa [#allocation3], 0  ;;  %1181 = vmatmul.mubr.msk.bf16.vlgmr.msra.gmra.mrb[0].mxu1 %vm125_vm3, %v1441_v27  ;;  %v76_v29 = vrot.slane %v1396_v1, 7  ;;  %vm86_vm4 = vcmask 261120   ;;  %v97_v38 = vlaneseq  ;;  %v1310_v40 = vmov 1966171168  }
  0x14   :  { %1198 = vmatprep.mubr.msk.bf16.mxu1 %vm1308_vm1, %v1307_v4  ;;  %v254_v41 = vunpack.c.l.s4 %v1310_v40  ;;  %v72_v43 = vld [vmem:[%s1702_s10] sm:$0x3]  ;;  %vm287_vm5 = vcmask 519168   ;;  %vm308_vm6 = vcmask 25600   ;;  %v1311_v13 = vmov 0   ;;  %v1243_v24 = vld [vmem:[%s1698_s6 + $0x8] sm:$0xff]  }
  0x15   :  { %v78_v30 = vsel %vm77_vm2, %v76_v29, %v1391_v0  ;;  %v1458_v39 = vshrl.u32 %v97_v38, 7  ;;  %v1479_v5 = vand.u32 127, %v97_v38  ;;  %1232 = vset.pattern.permute.xlu1 %v1311_v13  ;;  %1233 = vset.pattern.permute.xlu0 %v1311_v13  ;;  %v1242_v23 = vld [vmem:[%s1698_s6] sm:$0xff]   ;;  %vm494_vm7 = vcmask 1043456  }
  0x16   :  { %v255_v44 = vunpack.c.0.s8 %v254_v41  ;;  %vm437_vm8 = vcmask 257024   ;;  %vm490_vm9 = vcmask 326656   ;;  %vm539_vm10 = vcmask 254976  }
  0x17   :  { %v1461_v42 = vsub.s32 0, %v1458_v39  ;;  %v1467_v45 = vsub.s32 1, %v1458_v39  ;;  %v1483_v6 = vsub.s32 %v1479_v5, %v1458_v39  ;;  %vm808_vm11 = vcmask 261121  }
  0x18   :  { %v1471_v47 = vsub.s32 %v255_v44, %v1458_v39  ;;  %vm829_vm12 = vcmask 58376   ;;  %vm869_vm13 = vcmask 50176   ;;  %vm1089_vm14 = vcmask 293888  }
  0x19   :  { %v100_v46 = vrot.slane %v72_v43, %v1461_v42  ;;  %v181_v48 = vrot.slane %v72_v43, %v1467_v45 }
  0x84   :  { %v84_v31 = vpop.permute.xlu0 %83 }
  0x85   :  { %v87_v32 = vsel %vm86_vm4, %v78_v30, %v84_v31 }
  0x86   :  { %v96_v33 = vpack.c.bf16 %v87_v32, %v87_v32  ;;  %v1244_v32 = vld [vmem:[%s1700_s8] sm:$0xff]  }
  0x88   :  { %1169 = vmatmul.mubr.msk.bf16.vlgmr.msra.gmra.mrb[0].mxu0 %vm125_vm3, %v96_v33  ;;  %v1246_v33 = vld [vmem:[%s1700_s8 + $0x10] sm:$0xff]  }
  0x89   :  { %1188 = vmatprep.mubr.msk.bf16.mxu0 %vm1308_vm1, %v1307_v4  ;;  %1185 = vmatpush3.bf16.msra.mxu0 %v1242_v23 }
  0x8a   :  { %1186 = vmatprep.subr.bf16.mxu0 %v1307_v4 }
  0x8d   :  { %1187 = vmatpush3.bf16.msra.mxu0 %v1243_v24 }
  0x8e   :  { %1202 = vmatprep.subr.bf16.mxu0 %v1307_v4 }
  0x90   :  { %1189 = vmatmul.mubr.msk.bf16.vlgmr.msra.gmra.mrb[4].mxu0 %vm86_vm4, %v1441_v27  ;;  %v1245_v27 = vld [vmem:[%s1700_s8 + $0x8] sm:$0xff]  }
  0x91   :  { %1210 = vmatprep.mubr.msk.bf16.mxu0 %vm1308_vm1, %v1307_v4  ;;  %1203 = vmatpush3.bf16.msra.mxu0 %v1244_v32 }
  0x92   :  { %1204 = vmatprep.subr.bf16.mxu0 %v1307_v4 }
  0x95   :  { %1205 = vmatpush3.bf16.msra.mxu0 %v1245_v27 }
  0x96   :  { %1206 = vmatprep.subr.bf16.mxu0 %v1307_v4 }
  0x99   :  { %1207 = vmatpush3.bf16.msra.mxu0 %v1246_v33 }
  0x9a   :  { %1208 = vmatprep.subr.bf16.mxu0 %v1307_v4 }
  0xe6   :  { %v243_v34 = vpop.f32.mrb[0].mxu1 }
  0xe7   :  { %v1182_v35 = vpop.f32.mrb[1].mxu1  ;;  %v244_v55 = vadd.f32 %v243_v34, %v181_v48  ;;  %v1247_v34 = vld [vmem:[%s1700_s8 + $0x18] sm:$0xff]  }
  0xe8   :  { %v246_v36 = vpop.f32.mrb[2].mxu1  ;;  %1209 = vmatpush3.bf16.msra.mxu0 %v1247_v34  ;;  %v564_v35 = vld [vmem:[%s1694_s2] sm:$0xf] }
  0xe9   :  { %v1183_v37 = vpop.f32.mrb[3].mxu1  ;;  %v250_v58 = vcombine.high %v244_v55, %v244_v55 }
  0xeb   :  { %1211 = vmatmul.mubr.msk.bf16.vlgmr.msra.gmra.mrb[8].mxu0 %vm125_vm3, %v564_v35 }
 0x15b   :  { %v163_v49 = vpop.f32.mrb[0].mxu0 }
 0x15c   :  { %v164_v50 = vadd.f32 %v163_v49, %v100_v46  ;;  %v1170_v51 = vpop.f32.mrb[1].mxu0 }
 0x15d   :  { %v166_v52 = vpop.f32.mrb[2].mxu0  ;;  %v1248_v51 = vld [vmem:[%s1699_s7] sm:$0xff]  }
 0x15e   :  { %v259_v53 = vrot.slane %v164_v50, %v1471_v47  ;;  %v1171_v54 = vpop.f32.mrb[3].mxu0  ;;  %v454_v50 = vld [vmem:[%s1693_s1] sm:$0x3]  ;;  %1193 = vmatpush3.bf16.msra.mxu1 %v1248_v51  ;;  %v1249_v52 = vld [vmem:[%s1699_s7 + $0x8] sm:$0xff]  }
 0x15f   :  { %1194 = vmatprep.subr.bf16.mxu1 %v1307_v4 }
 0x160   :  { %v260_v56 = vcombine.high %v259_v53, %v259_v53  ;;  %v267_v57 = vrot.slane %v259_v53, %v1471_v47  ;;  %v1250_v53 = vld [vmem:[%s1699_s7 + $0x10] ss:$0 sps:$4 sm:$0xff]  }
 0x161   :  { %v496_v54 = vsel %vm494_vm7, %v1250_v53, 0 }
 0x162   :  { %v278_v59 = vrot.slane %v267_v57, %v1461_v42  ;;  %v274_v60 = vrot.slane %v260_v56, %v1471_v47  ;;  %1195 = vmatpush3.bf16.msra.mxu1 %v1249_v52 }
 0x163   :  { %v416_v36 = vpop.f32.mrb[4].mxu0  ;;  %1196 = vmatprep.subr.bf16.mxu1 %v1307_v4 }
 0x164   :  { %v285_v61 = vmul.f32 %v278_v59, %v244_v55  ;;  %v282_v62 = vrot.slane %v274_v60, %v1461_v42  ;;  %v1190_v37 = vpop.f32.mrb[5].mxu0  ;;  %v1547_v55 = vld [vmem:[%s1703_s11] sm:$0x7] }
 0x165   :  { %v419_v38 = vpop.f32.mrb[6].mxu0  ;;  %v576_v56 = vrot.slane %v1547_v55, %v1467_v45 }
 0x166   :  { %v288_v63 = vsel %vm287_vm5, %v285_v61, 0.0  ;;  %v286_v2 = vmul.f32 %v282_v62, %v250_v58  ;;  %v1191_v40 = vpop.f32.mrb[7].mxu0  ;;  %1197 = vmatpush3.bf16.msra.mxu1 %v496_v54 }
 0x167   :  { %289 = vadd.xlane.f32.xlu0 %v288_v63  ;;  %1214 = vmatprep.subr.bf16.mxu1 %v1307_v4  ;;  %v423_v63 = vcombine.high %v416_v36, %v416_v36 }
 0x168   :  { %v291_v3 = vsel %vm287_vm5, %v286_v2, 0.0 }
 0x169   :  { %292 = vadd.xlane.f32.xlu1 %v291_v3 }
 0x1be   :  { %v638_v57 = vpop.f32.mrb[8].mxu0 }
 0x1bf   :  { %v639_v58 = vadd.f32 %v638_v57, %v576_v56  ;;  %v1212_v59 = vpop.f32.mrb[9].mxu0 }
 0x1c0   :  { %v641_v60 = vpop.f32.mrb[10].mxu0 }
 0x1c1   :  { %v644_v61 = vsel %vm86_vm4, %v639_v58, 0.0  ;;  %v1213_v62 = vpop.f32.mrb[11].mxu0  ;;  %v1573_v60 = vld [vmem:[%s1705_s13] sm:$0xf] }
 0x1f4   :  { %v290_v7 = vpop.xlane.xlu0 %289 }
 0x1f5   :  { %v301_v9 = vrot.slane %v290_v7, %v1483_v6 }
 0x1f6   :  { %v293_v8 = vpop.xlane.xlu1 %292 }
 0x1f7   :  { %v305_v10 = vrot.slane %v293_v8, %v1483_v6 }
 0x1f9   :  { %v306_v11 = vsel %vm77_vm2, %v305_v10, %v301_v9 }
 0x1fa   :  { %v309_v12 = vsel %vm308_vm6, %v306_v11, -inf }
 0x1fb   :  { %310 = vmax.xlane.f32.xlu1 %v309_v12 }
 0x288   :  { %v311_v14 = vpop.xlane.xlu1 %310 }
 0x289   :  { %v316_v15 = vrot.slane %v311_v14, %v1461_v42  ;;  %v320_v16 = vrot.slane %v311_v14, %v1467_v45 }
 0x28b   :  { %v323_v17 = vsub.f32 %v290_v7, %v316_v15  ;;  %v324_v18 = vsub.f32 %v293_v8, %v320_v16 }
 0x28d   :  { %v325_v19 = vmul.f32 1.442695, %v323_v17  ;;  %v327_v20 = vmul.f32 1.442695, %v324_v18 }
 0x28f   :  { %1255 = vpow2.f32 %v325_v19 }
 0x290   :  { %1257 = vpow2.f32 %v327_v20 }
 0x299   :  { %v1256_v21 = vpop.eup %1255 }
 0x29a   :  { %332 = vperm.xlu1 %1232, %v1256_v21   ;;  %v1258_v22 = vpop.eup %1257 }
 0x29e   :  { %335 = vperm.xlu1 %1232, %v1258_v22  }
 0x319   :  { %v333_v25 = vpop.permute.xlu1 %332 }
 0x31a   :  { %v340_v28 = vrot.slane %v333_v25, %v1483_v6 }
 0x31d   :  { %v336_v26 = vpop.permute.xlu1 %335 }
 0x31e   :  { %v344_v29 = vrot.slane %v336_v26, %v1483_v6 }
 0x320   :  { %v345_v30 = vsel %vm77_vm2, %v344_v29, %v340_v28 }
 0x321   :  { %v347_v31 = vsel %vm308_vm6, %v345_v30, 0.0 }
 0x322   :  { %348 = vadd.xlane.f32.xlu1 %v347_v31  ;;  %v474_v31 = vrot.slane %v1547_v55, %v1461_v42 }
 0x3af   :  { %v349_v41 = vpop.xlane.xlu1 %348 }
 0x3b0   :  { %1259 = vrcp.f32 %v349_v41 }
 0x3ba   :  { %v1260_v43 = vpop.eup %1259 }
 0x3bb   :  { %v359_v44 = vrot.slane %v1260_v43, %v1467_v45  ;;  %v355_v46 = vrot.slane %v1260_v43, %v1461_v42 }
 0x3bd   :  { %v363_v48 = vmul.f32 %v1258_v22, %v359_v44  ;;  %v362_v49 = vmul.f32 %v1256_v21, %v355_v46 }
 0x3bf   :  { %432 = vperm.xlu0 %1233, %v363_v48   ;;  %427 = vperm.xlu1 %1232, %v362_v49  }
 0x3c3   :  { %461 = vrot.lane.b32.xlu0 %v454_v50, %s1309_s4 }
 0x3e2   :  { %645 = vadd.xlane.f32.xlu0 %v644_v61 }
 0x43e   :  { %v433_v2 = vpop.permute.xlu0 %432  ;;  %v428_v3 = vpop.permute.xlu1 %427 }
 0x43f   :  { %v436_v7 = vmul.f32 %v433_v2, %v423_v63  ;;  %v435_v8 = vmul.f32 %v428_v3, %v416_v36  ;;  %v562_v2 = vrot.slane %v1573_v60, %v1461_v42 }
 0x441   :  { %v445_v9 = vsel %vm437_vm8, %v436_v7, 0.0  ;;  %v438_v10 = vsel %vm437_vm8, %v435_v8, 0.0 }
 0x442   :  { %v446_v11 = vrot.slane %v445_v9, 4  ;;  %v439_v12 = vrot.slane %v438_v10, 4  ;;  %v462_v24 = vpop.permute.xlu0 %461 }
 0x444   :  { %v447_v13 = vadd.f32 %v446_v11, %v445_v9  ;;  %v440_v14 = vadd.f32 %v439_v12, %v438_v10 }
 0x446   :  { %v448_v15 = vrot.slane %v447_v13, 2  ;;  %v441_v16 = vrot.slane %v440_v14, 2 }
 0x448   :  { %v449_v17 = vadd.f32 %v448_v15, %v447_v13  ;;  %v442_v18 = vadd.f32 %v441_v16, %v440_v14  ;;  %v665_v13 = vrot.slane %v1573_v60, %v1467_v45 }
 0x44a   :  { %v450_v19 = vrot.slane %v449_v17, 1  ;;  %v443_v20 = vrot.slane %v442_v18, 1 }
 0x44c   :  { %v451_v21 = vadd.f32 %v450_v19, %v449_v17  ;;  %v444_v22 = vadd.f32 %v443_v20, %v442_v18 }
 0x44e   :  { %v453_v23 = vadd.f32 %v451_v21, %v1396_v1  ;;  %v452_v25 = vadd.f32 %v444_v22, %v1391_v0 }
 0x450   :  { %v457_v26 = vrot.slane %v453_v23, 7 }
 0x452   :  { %v458_v28 = vsel %vm77_vm2, %v457_v26, %v452_v25 }
 0x453   :  { %v464_v29 = vsel %vm86_vm4, %v458_v28, %v462_v24 }
 0x454   :  { %v470_v30 = vpack.c.bf16 %v464_v29, %v464_v29 }
 0x456   :  { %1199 = vmatmul.mubr.msk.bf16.vlgmr.msra.gmra.mrb[4].mxu1 %vm490_vm9, %v470_v30 }
 0x457   :  { %1222 = vmatprep.mubr.msk.bf16.mxu1 %vm1308_vm1, %v1307_v4 }
 0x46f   :  { %v646_v38 = vpop.xlane.xlu0 %645 }
 0x470   :  { %v647_v40 = vmul.f32 0.03125, %v646_v38 }
 0x472   :  { %v648_v44 = vsub.f32 %v639_v58, %v647_v40  ;;  %v1568_v58 = vld [vmem:[%s1704_s12] sm:$0xf] }
 0x473   :  { %v557_v61 = vrot.slane %v1568_v58, %v1461_v42  ;;  %v660_v7 = vrot.slane %v1568_v58, %v1467_v45 }
 0x474   :  { %v649_v50 = vmul.f32 %v648_v44, %v648_v44 }
 0x476   :  { %v650_v51 = vsel %vm86_vm4, %v649_v50, 0.0 }
 0x529   :  { %v532_v32 = vpop.f32.mrb[4].mxu1 }
 0x52a   :  { %v533_v27 = vadd.f32 %v532_v32, %v474_v31  ;;  %v1200_v33 = vpop.f32.mrb[5].mxu1 }
 0x52b   :  { %v535_v34 = vpop.f32.mrb[6].mxu1 }
 0x52c   :  { %1261 = vtanh.f32 %v533_v27  ;;  %v1201_v35 = vpop.f32.mrb[7].mxu1 }
 0x536   :  { %v1262_v36 = vpop.eup %1261 }
 0x537   :  { %v540_v37 = vsel %vm539_vm10, %v1262_v36, 0.0 }
 0x538   :  { %541 = vadd.xlane.f32.xlu1 %v540_v37 }
 0x5c5   :  { %v542_v41 = vpop.xlane.xlu1 %541 }
 0x5c6   :  { %v544_v43 = vmul.f32 0.03125, %v542_v41 }
 0x5c8   :  { %v545_v46 = vsub.f32 %v1262_v36, %v544_v43 }
 0x5ca   :  { %v546_v48 = vmul.f32 %v545_v46, %v545_v46 }
 0x5cc   :  { %v547_v49 = vsel %vm539_vm10, %v546_v48, 0.0 }
 0x5cd   :  { %548 = vadd.xlane.f32.xlu0 %v547_v49 }
 0x5d1   :  { %651 = vadd.xlane.f32.xlu0 %v650_v51 }
 0x65a   :  { %v549_v52 = vpop.xlane.xlu0 %548 }
 0x65b   :  { %v550_v53 = vmul.f32 0.03125, %v549_v52 }
 0x65d   :  { %v551_v54 = vadd.f32 1e-12, %v550_v53 }
 0x65e   :  { %v652_v56 = vpop.xlane.xlu0 %651 }
 0x65f   :  { %1263 = vrsqrt.f32 %v551_v54  ;;  %v653_v57 = vmul.f32 0.03125, %v652_v56 }
 0x661   :  { %v654_v59 = vadd.f32 1e-12, %v653_v57 }
 0x663   :  { %1265 = vrsqrt.f32 %v654_v59 }
 0x669   :  { %v1264_v62 = vpop.eup %1263 }
 0x66a   :  { %v553_v63 = vmul.f32 %v1264_v62, %v545_v46 }
 0x66c   :  { %v558_v3 = vmul.f32 %v557_v61, %v553_v63 }
 0x66d   :  { %v1266_v8 = vpop.eup %1265 }
 0x66e   :  { %v1581_v9 = vadd.f32 %v562_v2, %v558_v3  ;;  %v656_v10 = vmul.f32 %v1266_v8, %v648_v44 }
 0x670   :  { %v677_v11 = vrot.slane %v1581_v9, %v1471_v47  ;;  %v661_v12 = vmul.f32 %v660_v7, %v656_v10 }
 0x672   :  { %v685_v14 = vrot.slane %v677_v11, %v1471_v47  ;;  %v678_v15 = vcombine.high %v677_v11, %v677_v11  ;;  %v1590_v18 = vadd.f32 %v665_v13, %v661_v12  ;;  %v858_v11 = vadd.s32 1, %v1479_v5 }
 0x674   :  { %v696_v16 = vrot.slane %v685_v14, %v1461_v42  ;;  %v692_v17 = vrot.slane %v678_v15, %v1471_v47  ;;  %v1598_v24 = vcombine.high %v1590_v18, %v1590_v18  ;;  %v861_v12 = vsub.s32 %v858_v11, %v1458_v39 }
 0x676   :  { %v806_v19 = vmul.f32 %v696_v16, %v1391_v0  ;;  %v700_v20 = vrot.slane %v692_v17, %v1461_v42  ;;  %v703_v23 = vmul.f32 %v696_v16, %v1590_v18 }
 0x678   :  { %v809_v21 = vsel %vm808_vm11, %v806_v19, 0.0  ;;  %v807_v22 = vmul.f32 %v700_v20, %v1396_v1  ;;  %v704_v47 = vmul.f32 %v700_v20, %v1598_v24  ;;  %v705_v26 = vsel %vm437_vm8, %v703_v23, 0.0 }
 0x679   :  { %810 = vadd.xlane.f32.xlu1 %v809_v21 }
 0x67a   :  { %v812_v25 = vsel %vm808_vm11, %v807_v22, 0.0  ;;  %v708_v28 = vsel %vm437_vm8, %v704_v47, 0.0 }
 0x67b   :  { %813 = vadd.xlane.f32.xlu0 %v812_v25 }
 0x67d   :  { %706 = vadd.xlane.f32.xlu1 %v705_v26 }
 0x67f   :  { %709 = vadd.xlane.f32.xlu0 %v708_v28 }
 0x706   :  { %v811_v29 = vpop.xlane.xlu1 %810 }
 0x707   :  { %v815_v30 = vmul.f32 0.17677669, %v811_v29 }
 0x708   :  { %v814_v31 = vpop.xlane.xlu0 %813 }
 0x709   :  { %v816_v32 = vmul.f32 0.17677669, %v814_v31  ;;  %v822_v33 = vrot.slane %v815_v30, %v1483_v6 }
 0x70a   :  { %v707_v27 = vpop.xlane.xlu1 %706 }
 0x70b   :  { %v826_v34 = vrot.slane %v816_v32, %v1483_v6  ;;  %v1605_v35 = vmul.f32 0.17677669, %v707_v27 }
 0x70c   :  { %v710_v36 = vpop.xlane.xlu0 %709 }
 0x70d   :  { %v1607_v37 = vmul.f32 0.17677669, %v710_v36  ;;  %v827_v38 = vsel %vm77_vm2, %v826_v34, %v822_v33  ;;  %v718_v41 = vrot.slane %v1605_v35, %v1483_v6 }
 0x70e   :  { %v830_v40 = vsel %vm829_vm12, %v827_v38, -inf }
 0x70f   :  { %v722_v43 = vrot.slane %v1607_v37, %v1483_v6  ;;  %831 = vmax.xlane.f32.xlu1 %v830_v40 }
 0x711   :  { %v723_v44 = vsel %vm77_vm2, %v722_v43, %v718_v41 }
 0x712   :  { %v725_v46 = vsel %vm308_vm6, %v723_v44, -inf }
 0x713   :  { %726 = vmax.xlane.f32.xlu0 %v725_v46 }
 0x79c   :  { %v832_v48 = vpop.xlane.xlu1 %831 }
 0x79d   :  { %v837_v49 = vrot.slane %v832_v48, %v1461_v42  ;;  %v841_v50 = vrot.slane %v832_v48, %v1467_v45 }
 0x79f   :  { %v844_v51 = vsub.f32 %v815_v30, %v837_v49  ;;  %v845_v52 = vsub.f32 %v816_v32, %v841_v50 }
 0x7a0   :  { %v727_v53 = vpop.xlane.xlu0 %726 }
 0x7a1   :  { %v846_v54 = vmul.f32 1.442695, %v844_v51  ;;  %v848_v56 = vmul.f32 1.442695, %v845_v52  ;;  %v732_v57 = vrot.slane %v727_v53, %v1461_v42  ;;  %v736_v59 = vrot.slane %v727_v53, %v1467_v45 }
 0x7a3   :  { %1267 = vpow2.f32 %v846_v54  ;;  %v739_v61 = vsub.f32 %v1605_v35, %v732_v57  ;;  %v740_v62 = vsub.f32 %v1607_v37, %v736_v59 }
 0x7a4   :  { %1269 = vpow2.f32 %v848_v56 }
 0x7a5   :  { %v741_v63 = vmul.f32 1.442695, %v739_v61  ;;  %v743_v2 = vmul.f32 1.442695, %v740_v62 }
 0x7a7   :  { %1271 = vpow2.f32 %v741_v63 }
 0x7a8   :  { %1273 = vpow2.f32 %v743_v2 }
 0x7ad   :  { %v1268_v3 = vpop.eup %1267 }
 0x7ae   :  { %v1270_v7 = vpop.eup %1269  ;;  %853 = vperm.xlu1 %1232, %v1268_v3  }
 0x7af   :  { %856 = vperm.xlu0 %1233, %v1270_v7  }
 0x7b1   :  { %v1272_v8 = vpop.eup %1271 }
 0x7b2   :  { %748 = vperm.xlu1 %1232, %v1272_v8   ;;  %v1274_v10 = vpop.eup %1273 }
 0x7b6   :  { %751 = vperm.xlu1 %1232, %v1274_v10  }
 0x82d   :  { %v854_v13 = vpop.permute.xlu1 %853 }
 0x82e   :  { %v862_v14 = vrot.slane %v854_v13, %v861_v12  ;;  %v857_v15 = vpop.permute.xlu0 %856 }
 0x82f   :  { %v866_v16 = vrot.slane %v857_v15, %v861_v12 }
 0x831   :  { %v749_v17 = vpop.permute.xlu1 %748  ;;  %v867_v19 = vsel %vm77_vm2, %v866_v16, %v862_v14 }
 0x832   :  { %v870_v20 = vsel %vm869_vm13, %v867_v19, 0.0  ;;  %v756_v22 = vrot.slane %v749_v17, %v1483_v6 }
 0x833   :  { %871 = vadd.xlane.f32.xlu1 %v870_v20 }
 0x835   :  { %v752_v21 = vpop.permute.xlu1 %751 }
 0x836   :  { %v760_v23 = vrot.slane %v752_v21, %v1483_v6 }
 0x838   :  { %v761_v25 = vsel %vm77_vm2, %v760_v23, %v756_v22 }
 0x839   :  { %v763_v47 = vsel %vm308_vm6, %v761_v25, 0.0 }
 0x83a   :  { %764 = vadd.xlane.f32.xlu0 %v763_v47 }
 0x8c0   :  { %v872_v26 = vpop.xlane.xlu1 %871 }
 0x8c1   :  { %1275 = vrcp.f32 %v872_v26 }
 0x8c7   :  { %v765_v28 = vpop.xlane.xlu0 %764 }
 0x8c8   :  { %1277 = vrcp.f32 %v765_v28 }
 0x8cb   :  { %v1276_v29 = vpop.eup %1275 }
 0x8cc   :  { %v882_v30 = vrot.slane %v1276_v29, %v1467_v45  ;;  %v878_v31 = vrot.slane %v1276_v29, %v1461_v42 }
 0x8ce   :  { %v886_v32 = vmul.f32 %v1270_v7, %v882_v30  ;;  %v885_v27 = vmul.f32 %v1268_v3, %v878_v31 }
 0x8d0   :  { %894 = vperm.xlu1 %1232, %v886_v32   ;;  %889 = vperm.xlu0 %1233, %v885_v27  }
 0x8d2   :  { %v1278_v33 = vpop.eup %1277 }
 0x8d3   :  { %v775_v6 = vrot.slane %v1278_v33, %v1467_v45  ;;  %v771_v34 = vrot.slane %v1278_v33, %v1461_v42 }
 0x8d5   :  { %v779_v36 = vmul.f32 %v1274_v10, %v775_v6  ;;  %v778_v38 = vmul.f32 %v1272_v8, %v771_v34  ;;  %v1251_v34 = vld [vmem:[%s1701_s9] sm:$0xff]  }
 0x8d6   :  { %1215 = vmatpush3.bf16.msra.mxu1 %v1251_v34 }
 0x8d7   :  { %787 = vperm.xlu0 %1233, %v779_v36   ;;  %782 = vperm.xlu1 %1232, %v778_v38   ;;  %v1252_v36 = vld [vmem:[%s1701_s9 + $0x8] sm:$0xff]   ;;  %v1253_v38 = vld [vmem:[%s1701_s9 + $0x10] sm:$0xff]  }
 0x8d8   :  { %1216 = vmatprep.subr.bf16.mxu1 %v1307_v4 }
 0x8da   :  { %1217 = vmatpush3.bf16.msra.mxu1 %v1252_v36 }
 0x8db   :  { %1218 = vmatprep.subr.bf16.mxu1 %v1307_v4 }
 0x8de   :  { %1219 = vmatpush3.bf16.msra.mxu1 %v1253_v38 }
 0x8df   :  { %1220 = vmatprep.subr.bf16.mxu1 %v1307_v4 }
 0x94f   :  { %v895_v40 = vpop.permute.xlu1 %894  ;;  %v890_v41 = vpop.permute.xlu0 %889 }
 0x950   :  { %v898_v43 = vmul.f32 %v895_v40, %v1396_v1  ;;  %v897_v44 = vmul.f32 %v890_v41, %v1391_v0 }
 0x952   :  { %v902_v46 = vrot.slane %v898_v43, 1  ;;  %v901_v48 = vrot.slane %v897_v44, 1  ;;  %v1254_v44 = vld [vmem:[%s1701_s9 + $0x18] sm:$0xff]   ;;  %s1312_s9 = smov [#allocation2]  }
 0x953   :  { %1221 = vmatpush3.bf16.msra.mxu1 %v1254_v44 }
 0x954   :  { %v912_v49 = vsel %vm57_vm0, %v902_v46, 0.0  ;;  %v905_v50 = vsel %vm57_vm0, %v901_v48, 0.0  ;;  %v956_v48 = vsub.s32 2, %v1458_v39 }
 0x955   :  { %v913_v51 = vrot.slane %v912_v49, 4  ;;  %v906_v45 = vrot.slane %v905_v50, 4 }
 0x956   :  { %v783_v52 = vpop.permute.xlu1 %782  ;;  %v788_v42 = vpop.permute.xlu0 %787  ;;  %v967_v4 = vrot.slane %v1573_v60, %v956_v48 }
 0x957   :  { %v914_v53 = vadd.f32 %v913_v51, %v912_v49  ;;  %v907_v54 = vadd.f32 %v906_v45, %v905_v50  ;;  %v790_v56 = vmul.f32 %v783_v52, %v1590_v18  ;;  %v791_v57 = vmul.f32 %v788_v42, %v1598_v24 }
 0x958   :  { %v957_v51 = vrot.slane %v1568_v58, %v956_v48 }
 0x959   :  { %v915_v59 = vrot.slane %v914_v53, 2  ;;  %v908_v1 = vrot.slane %v907_v54, 2  ;;  %v792_v0 = vsel %vm437_vm8, %v790_v56, 0.0  ;;  %v799_v61 = vsel %vm437_vm8, %v791_v57, 0.0 }
 0x95a   :  { %v793_v62 = vrot.slane %v792_v0, 4  ;;  %v800_v63 = vrot.slane %v799_v61, 4 }
 0x95b   :  { %v916_v2 = vadd.f32 %v915_v59, %v914_v53  ;;  %v909_v3 = vadd.f32 %v908_v1, %v907_v54  ;;  %v986_v1 = vrot.slane %v1547_v55, %v956_v48  ;;  %v1069_v55 = vsub.s32 3, %v1458_v39 }
 0x95c   :  { %v794_v7 = vadd.f32 %v793_v62, %v792_v0  ;;  %v801_v8 = vadd.f32 %v800_v63, %v799_v61 }
 0x95d   :  { %v917_v12 = vrot.slane %v916_v2, 1  ;;  %v910_v13 = vrot.slane %v909_v3, 1 }
 0x95e   :  { %v795_v10 = vrot.slane %v794_v7, 2  ;;  %v802_v11 = vrot.slane %v801_v8, 2 }
 0x95f   :  { %v911_v19 = vadd.f32 %v910_v13, %v909_v3  ;;  %v918_v20 = vadd.f32 %v917_v12, %v916_v2 }
 0x960   :  { %v796_v14 = vadd.f32 %v795_v10, %v794_v7  ;;  %v803_v18 = vadd.f32 %v802_v11, %v801_v8 }
 0x962   :  { %v797_v15 = vrot.slane %v796_v14, 1  ;;  %v804_v24 = vrot.slane %v803_v18, 1 }
 0x964   :  { %v798_v16 = vadd.f32 %v797_v15, %v796_v14  ;;  %v805_v17 = vadd.f32 %v804_v24, %v803_v18  ;;  %v1077_v18 = vadd.s32 4294967264, %v1479_v5  ;;  %v1070_v15 = vrot.slane %v1568_v58, %v1069_v55 }
 0x966   :  { %v919_v21 = vmul.f32 %v911_v19, %v798_v16  ;;  %v920_v22 = vmul.f32 %v918_v20, %v805_v17  ;;  %v1080_v16 = vsub.s32 %v1077_v18, %v1458_v39  ;;  %v1075_v19 = vrot.slane %v1573_v60, %v1069_v55 }
 0x968   :  { %v923_v23 = vsel %vm77_vm2, %v920_v22, %v919_v21  ;;  %v1085_v20 = vrot.slane %v1607_v37, %v1080_v16 }
 0x969   :  { %v925_v25 = vsel %vm539_vm10, %v923_v23, 0.0 }
 0x96a   :  { %926 = vadd.xlane.f32.xlu1 %v925_v25 }
 0x9f7   :  { %v927_v47 = vpop.xlane.xlu1 %926 }
 0x9f8   :  { %v928_v26 = vmul.f32 0.03125, %v927_v47 }
 0x9fa   :  { %v930_v28 = vrot.slane %v928_v26, 1  ;;  %v933_v29 = vsub.f32 %v919_v21, %v928_v26 }
 0x9fc   :  { %v934_v30 = vsub.f32 %v920_v22, %v930_v28  ;;  %v935_v32 = vmul.f32 %v933_v29, %v933_v29  ;;  %v1081_v22 = vrot.slane %v1605_v35, %v1080_v16 }
 0x9fe   :  { %v936_v31 = vmul.f32 %v934_v30, %v934_v30  ;;  %v1086_v25 = vsel %vm77_vm2, %v1085_v20, %v1081_v22 }
 0xa00   :  { %v939_v27 = vrot.slane %v936_v31, 7 }
 0xa02   :  { %v940_v33 = vsel %vm77_vm2, %v939_v27, %v935_v32 }
 0xa03   :  { %v942_v6 = vsel %vm539_vm10, %v940_v33, 0.0 }
 0xa04   :  { %943 = vadd.xlane.f32.xlu0 %v942_v6 }
 0xa91   :  { %v944_v40 = vpop.xlane.xlu0 %943 }
 0xa92   :  { %v945_v41 = vmul.f32 0.03125, %v944_v40 }
 0xa94   :  { %v946_v43 = vadd.f32 1e-12, %v945_v41 }
 0xa96   :  { %1279 = vrsqrt.f32 %v946_v43 }
 0xaa0   :  { %v1280_v46 = vpop.eup %1279 }
 0xaa1   :  { %v949_v49 = vrot.slane %v1280_v46, 1  ;;  %v952_v45 = vmul.f32 %v1280_v46, %v933_v29 }
 0xaa3   :  { %v953_v50 = vmul.f32 %v949_v49, %v934_v30 }
 0xaa5   :  { %v960_v52 = vrot.slane %v953_v50, 7 }
 0xaa7   :  { %v961_v42 = vsel %vm77_vm2, %v960_v52, %v952_v45 }
 0xaa8   :  { %v963_v53 = vmul.f32 %v961_v42, %v957_v51 }
 0xaaa   :  { %v968_v54 = vadd.f32 %v967_v4, %v963_v53 }
 0xaac   :  { %970 = vrot.lane.b32.xlu0 %v968_v54, %s1309_s4  ;;  %s1098_s4 = sshll.u32 %s1312_s9, 4  ;;  %s1099_s4 = int_to_ptr.vmem [resolvable:$true] %s1098_s4 }
 0xaad   :  { %s1283_s23 = scalar_lea.vmem %s1099_s4, 32  ;;  %p1288_p1 = scmp.lt.s32.totalorder %s1099_s4, %s1099_s4 }
 0xaae   :  { %p1284_p0 = scmp.ne.s32.totalorder %s1099_s4, %s1283_s23  ;;  %p1289_p2 = scmp.lt.s32.totalorder %s1283_s23, %s1283_s23 }
 0xab0   :  { %p1290_p3 = por %p1289_p2, %p1288_p1 }
 0xab2   :  { %p1291_p4 = pnand %p1290_p3, %p1284_p0 }
 0xb1e   :  { %v971_v56 = vpop.permute.xlu0 %970 }
 0xb1f   :  { %v973_v57 = vsel %vm86_vm4, %v1581_v9, %v971_v56 }
 0xb20   :  { %v982_v59 = vpack.c.bf16 %v973_v57, %v973_v57 }
 0xb22   :  { %1223 = vmatmul.mubr.msk.bf16.vlgmr.msra.gmra.mrb[8].mxu1 %vm125_vm3, %v982_v59 }
 0xbf5   :  { %v1048_v0 = vpop.f32.mrb[8].mxu1 }
 0xbf6   :  { %v1049_v61 = vadd.f32 %v1048_v0, %v986_v1  ;;  %v1224_v62 = vpop.f32.mrb[9].mxu1 }
 0xbf7   :  { %v1051_v63 = vpop.f32.mrb[10].mxu1 }
 0xbf8   :  { %v1225_v2 = vpop.f32.mrb[11].mxu1  ;;  %v1054_v3 = vsel %vm539_vm10, %v1049_v61, 0.0 }
 0xbf9   :  { %1055 = vadd.xlane.f32.xlu1 %v1054_v3 }
 0xc86   :  { %v1056_v7 = vpop.xlane.xlu1 %1055 }
 0xc87   :  { %v1057_v8 = vmul.f32 0.03125, %v1056_v7 }
 0xc89   :  { %v1058_v10 = vsub.f32 %v1049_v61, %v1057_v8 }
 0xc8b   :  { %v1059_v11 = vmul.f32 %v1058_v10, %v1058_v10 }
 0xc8d   :  { %v1060_v12 = vsel %vm539_vm10, %v1059_v11, 0.0 }
 0xc8e   :  { %1061 = vadd.xlane.f32.xlu1 %v1060_v12 }
 0xd1b   :  { %v1062_v9 = vpop.xlane.xlu1 %1061 }
 0xd1c   :  { %v1063_v13 = vmul.f32 0.03125, %v1062_v9 }
 0xd1e   :  { %v1064_v14 = vadd.f32 1e-12, %v1063_v13 }
 0xd20   :  { %1281 = vrsqrt.f32 %v1064_v14 }
 0xd2a   :  { %v1282_v24 = vpop.eup %1281 }
 0xd2b   :  { %v1066_v17 = vmul.f32 %v1282_v24, %v1058_v10 }
 0xd2d   :  { %v1071_v21 = vmul.f32 %v1070_v15, %v1066_v17 }
 0xd2f   :  { %v1076_v23 = vadd.f32 %v1075_v19, %v1071_v21 }
 0xd31   :  { %v1088_v5 = vsel %vm86_vm4, %v1076_v23, %v1086_v25 }
 0xd32   :  { %v1090_v58 = vsel %vm1089_vm14, %v1088_v5, 0.0 }
 0xd33   :  { %1091 = vst [vmem:[#allocation2] sm:$0x3] %v1090_v58 }
 0xd34   :  { %1294 = shalt.err (!%p1291_p4)
}
 0xd35   :  { %s1295_s26 = scalar_lea.hbm %s1706_s14, 32 }
 0xd36   :  { %p1296_p5 = scmp.ne.s32.totalorder %s1706_s14, %s1295_s26  ;;  %p1299_p6 = scmp.lt.u32.totalorder %s1295_s26, %s1706_s14 }
 0xd38   :  { %p1301_p7 = pnand %p1299_p6, %p1296_p5 }
 0xd3a   :  { %1304 = shalt.err (!%p1301_p7)
}
 0xd3b   :  { %1101 = dma.vmem_to_hbm [thread:$0]  %s1099_s4, 32, %s1706_s14, [#allocation3]  }
 0xd3c   :  { %1305 = dma.done.wait [#allocation3], 32  }
 0xd3d   :  { %1306 = vsyncadd [#allocation3], 4294967264 }
 0xd3e   :  { %1105 = vsyncpa [#allocation3], 1 }

</bundles_post_ra>
